<compile_context>
chip_gen: v7x
topology: tpu7x:2x2x1
jax: 0.10.0
libtpu: 0.0.40
codegen_flags: <defaults>
</compile_context>

<pallas_src>
import functools

import jax
import jax.numpy as jnp
import numpy as np
from jax.experimental import pallas as pl
from jax.experimental.pallas import tpu as pltpu


# --------------------------------------------------------------------------
# Pass 1: bias-free conv of a block of Bn images + partial BN statistics.
# Also writes the conv slab so pass 2 never recomputes the conv / im2col.
# --------------------------------------------------------------------------
def conv_stats_kernel(xp_ref, w_ref, mask_ref, slab_ref, sum_ref, sqsum_ref,
                      p_ref, *, wp2, gp):
    bn = xp_ref.shape[0]
    cin = xp_ref.shape[1]

    # im2col: one (Cin, Gp) contiguous lane-slice copy per (image, tap).
    # Destination lane offsets b*Gp are 128-aligned; source offsets
    # delta = dy*Wp2+dx are not.
    # TODO(synk): derive the dx=1,2 taps from the dx=0 slice with pltpu.roll
    # (wrapped lanes land in masked / sliced-off columns) to cut unaligned
    # loads 3x if the bundle dump shows vld pressure here.
    for b in range(bn):
        c0 = b * gp
        for t in range(9):
            dy, dx = divmod(t, 3)
            delta = dy * wp2 + dx
            p_ref[t * cin:(t + 1) * cin, c0:c0 + gp] = \
                xp_ref[b, :, pl.ds(delta, gp)]

    # Single MXU contraction per grid step: (Cout, 9Cin) @ (9Cin, Bn*Gp).
    # TODO(synk): for larger channel counts cast w/p to bf16 (keep f32 accum).
    y = jnp.dot(w_ref[...], p_ref[...], preferred_element_type=jnp.float32)

    # One masked sweep + one lane (XLU) reduction per statistic per step.
    ym = y * mask_ref[...]
    sum_ref[0] = jnp.sum(ym, axis=1, keepdims=True)
    sqsum_ref[0] = jnp.sum(ym * ym, axis=1, keepdims=True)

    # Write the conv slab (128-aligned lane slices of the matmul result).
    for b in range(bn):
        slab_ref[b] = y[:, b * gp:(b + 1) * gp].astype(slab_ref.dtype)


# --------------------------------------------------------------------------
# Pass 2: pure affine (folded BN) + ReLU over the stored conv slab, in place.
# --------------------------------------------------------------------------
def bn_relu_kernel(slab_ref, scale_ref, bias_ref, out_ref):
    out_ref[...] = jnp.maximum(
        slab_ref[...] * scale_ref[...] + bias_ref[...], 0.0
    ).astype(out_ref.dtype)


# --------------------------------------------------------------------------
# Wrapper: CBR forward pass (PyTorch NCHW convention in and out).
# --------------------------------------------------------------------------
def _pick_batch_block(n, bytes_per_item, budget_bytes):
    # Largest divisor of n under the VMEM budget, capped so the grid keeps at
    # least 2 steps whenever n >= 2 (megacore / v7x gets both TCs busy).
    cap = n if n < 2 else n // 2
    best = 1
    for d in range(1, cap + 1):
        if n % d == 0 and d * bytes_per_item <= budget_bytes:
            best = d
    return best


def cbr_forward(x_nchw, w_oihw, conv_b, gamma, beta, eps=1e-5):
    N, Cin, H, W = x_nchw.shape
    Cout = w_oihw.shape[0]
    Wp2 = W + 2
    L = (H + 2) * Wp2                        # flattened padded-image length
    HW2 = H * Wp2                            # slab columns that carry pixels
    Gp = ((HW2 + 127) // 128) * 128          # lane-aligned slab width
    Lp = Gp + 2 * Wp2 + 2                    # padded length so all taps fit

    # ---- XLA-side layout plumbing (kept out of the kernels) ----------------
    xpad = jnp.pad(x_nchw.astype(jnp.float32), ((0, 0), (0, 0), (1, 1), (1, 1)))
    xflat = jnp.pad(xpad.reshape(N, Cin, L), ((0, 0), (0, 0), (0, Lp - L)))

    # (Cout, Cin, 3, 3) -> (Cout, 9*Cin) with tap order (dy, dx, ci).
    wmat = jnp.transpose(w_oihw.astype(jnp.float32),
                         (0, 2, 3, 1)).reshape(Cout, 9 * Cin)

    # Slab column g = h*(W+2)+w is a real output pixel iff w < W and g < H*(W+2).
    lane = jnp.arange(Gp, dtype=jnp.int32)
    valid = ((lane % Wp2) < W) & (lane < HW2)
    mask = valid.astype(jnp.float32).reshape(1, Gp)

    # ---- batch block size (accounting for double-buffering + scratch) ------
    bytes_per_item = 4 * (2 * Cin * Lp          # double-buffered input block
                          + 2 * Cout * Gp       # double-buffered slab block
                          + 9 * Cin * Gp        # im2col scratch
                          + 2 * Gp)             # mask block
    Bn = _pick_batch_block(N, bytes_per_item, budget_bytes=12 * 1024 * 1024)
    nblk = N // Bn

    cparams = pltpu.CompilerParams(
        dimension_semantics=("parallel",),
        vmem_limit_bytes=32 * 1024 * 1024,      # fits v5e/v6e (128 MiB) & v7x (64 MiB)
    )

    # ---- pass 1: conv + slab + per-block partial sum / sum-of-squares ------
    slab, psum, psq = pl.pallas_call(
        functools.partial(conv_stats_kernel, wp2=Wp2, gp=Gp),
        out_shape=(
            jax.ShapeDtypeStruct((N, Cout, Gp), jnp.float32),
            jax.ShapeDtypeStruct((nblk, Cout, 1), jnp.float32),
            jax.ShapeDtypeStruct((nblk, Cout, 1), jnp.float32),
        ),
        grid=(nblk,),
        in_specs=[
            pl.BlockSpec((Bn, Cin, Lp), lambda i: (i, 0, 0)),
            pl.BlockSpec((Cout, 9 * Cin), lambda i: (0, 0)),
            pl.BlockSpec((1, Bn * Gp), lambda i: (0, 0)),
        ],
        out_specs=(
            pl.BlockSpec((Bn, Cout, Gp), lambda i: (i, 0, 0)),
            pl.BlockSpec((1, Cout, 1), lambda i: (i, 0, 0)),
            pl.BlockSpec((1, Cout, 1), lambda i: (i, 0, 0)),
        ),
        scratch_shapes=[pltpu.VMEM((9 * Cin, Bn * Gp), jnp.float32)],
        compiler_params=cparams,
    )(xflat, wmat, jnp.tile(mask, (1, Bn)))

    # ---- BN statistics / affine folding (tiny, done in XLA) ----------------
    count = jnp.float32(N * H * W)
    mean = jnp.sum(psum[:, :, 0], axis=0) / count          # bias-free conv mean
    var = jnp.sum(psq[:, :, 0], axis=0) / count - mean * mean
    var = jnp.maximum(var, 0.0)     # single-pass variance; clamp rounding noise
    scale = gamma.astype(jnp.float32) / jnp.sqrt(var + eps)
    # Conv bias shifts the batch mean by exactly itself, so it cancels out of
    # training-mode BN: the fused output is independent of conv_b.
    bias = beta.astype(jnp.float32) - scale * mean
    _ = conv_b  # mathematically has no effect on the fused CBR output

    # ---- pass 2: affine + ReLU, in place over the slab ---------------------
    out_slab = pl.pallas_call(
        bn_relu_kernel,
        out_shape=jax.ShapeDtypeStruct((N, Cout, Gp), jnp.float32),
        grid=(nblk,),
        in_specs=[
            pl.BlockSpec((Bn, Cout, Gp), lambda i: (i, 0, 0)),
            pl.BlockSpec((1, Cout, 1), lambda i: (0, 0, 0)),
            pl.BlockSpec((1, Cout, 1), lambda i: (0, 0, 0)),
        ],
        out_specs=pl.BlockSpec((Bn, Cout, Gp), lambda i: (i, 0, 0)),
        input_output_aliases={0: 0},
        compiler_params=cparams,
    )(slab, scale.reshape(1, Cout, 1), bias.reshape(1, Cout, 1))

    # ---- epilogue: drop strided-layout junk columns (slice + free reshape) --
    y = out_slab[:, :, :HW2].reshape(N, Cout, H, Wp2)[:, :, :, :W]
    return y


# --------------------------------------------------------------------------
# Pure-JAX reference (silent correctness check).
# --------------------------------------------------------------------------
def cbr_reference(x_nchw, w_oihw, conv_b, gamma, beta, eps=1e-5):
    y = jax.lax.conv_general_dilated(
        x_nchw.astype(jnp.float32), w_oihw.astype(jnp.float32),
        window_strides=(1, 1), padding="SAME",
        dimension_numbers=("NCHW", "OIHW", "NCHW"))
    y = y + conv_b[None, :, None, None]
    mean = jnp.mean(y, axis=(0, 2, 3))
    var = jnp.mean((y - mean[None, :, None, None]) ** 2, axis=(0, 2, 3))
    yhat = (y - mean[None, :, None, None]) / jnp.sqrt(var[None, :, None, None] + eps)
    yhat = yhat * gamma[None, :, None, None] + beta[None, :, None, None]
    return jnp.maximum(yhat, 0.0)


if __name__ == "__main__":
    # Small shapes consistent with CBR(in_channels=3, out_channels=3).
    N, Cin, Cout, H, W = 2, 3, 3, 16, 16

    key = jax.random.PRNGKey(0)
    kx, kw, kb, kg, kbeta = jax.random.split(key, 5)

    x = jax.random.normal(kx, (N, Cin, H, W), dtype=jnp.float32)
    conv_w = jax.random.normal(kw, (Cout, Cin, 3, 3), dtype=jnp.float32) * 0.1
    conv_b = jax.random.normal(kb, (Cout,), dtype=jnp.float32) * 0.1
    gamma = 1.0 + 0.1 * jax.random.normal(kg, (Cout,), dtype=jnp.float32)
    beta = 0.1 * jax.random.normal(kbeta, (Cout,), dtype=jnp.float32)

    cbr = jax.jit(cbr_forward)
    out = jax.block_until_ready(cbr(x, conv_w, conv_b, gamma, beta))

    ref = cbr_reference(x, conv_w, conv_b, gamma, beta)
    np.testing.assert_allclose(np.asarray(out), np.asarray(ref),
                               rtol=1e-4, atol=2e-4)

    # NOTE: nn.BatchNorm2d also updates running_mean/running_var buffers as a
    # training side effect; that state update is not part of the forward
    # output and is not computed here (add conv_b back to the mean if exporting).
    print("KERNEL_OK")
</pallas_src>

<mosaic_0001>
module attributes {stable_mosaic.version = 11 : i64} {
  func.func @conv_stats_kernel(%arg0: i32, %arg1: memref<1x3x422xf32, #tpu.memory_space<vmem>>, %arg2: memref<3x27xf32, #tpu.memory_space<vmem>>, %arg3: memref<1x384xf32, #tpu.memory_space<vmem>>, %arg4: memref<1x3x384xf32, #tpu.memory_space<vmem>>, %arg5: memref<1x3x1xf32, #tpu.memory_space<vmem>>, %arg6: memref<1x3x1xf32, #tpu.memory_space<vmem>>, %arg7: memref<27x384xf32, #tpu.memory_space<vmem>>) attributes {dimension_semantics = [#tpu.dimension_semantics<parallel>], iteration_bounds = array<i64: 2>, scalar_prefetch = 0 : i64, scratch_operands = 1 : i64, tpu.core_type = #tpu.core_type<tc>, window_params = [{transform_indices = @transform_0, window_bounds = array<i64: 1, 3, 422>}, {pipeline_mode = #tpu.pipeline_mode<synchronous>, transform_indices = @transform_1, window_bounds = array<i64: 3, 27>}, {pipeline_mode = #tpu.pipeline_mode<synchronous>, transform_indices = @transform_2, window_bounds = array<i64: 1, 384>}, {transform_indices = @transform_3, window_bounds = array<i64: 1, 3, 384>}, {transform_indices = @transform_4, window_bounds = array<i64: 1, 3, 1>}, {transform_indices = @transform_5, window_bounds = array<i64: 1, 3, 1>}]} {
    %c0 = arith.constant 0 : index
    %c0_0 = arith.constant 0 : index
    %c0_1 = arith.constant 0 : index
    %0 = vector.load %arg1[%c0, %c0_0, %c0_1] : memref<1x3x422xf32, #tpu.memory_space<vmem>>, vector<1x3x384xf32>
    %1 = vector.shape_cast %0 : vector<1x3x384xf32> to vector<3x384xf32>
    %c0_2 = arith.constant 0 : index
    %c0_3 = arith.constant 0 : index
    %2 = vector.load %arg7[%c0_2, %c0_3] : memref<27x384xf32, #tpu.memory_space<vmem>>, vector<3x384xf32>
    tpu.vector_store %arg7[%c0_2, %c0_3], %1 {strides = array<i32>} : memref<27x384xf32, #tpu.memory_space<vmem>>, vector<3x384xf32>,
    %c0_4 = arith.constant 0 : index
    %c0_5 = arith.constant 0 : index
    %c1 = arith.constant 1 : index
    %3 = vector.load %arg1[%c0_4, %c0_5, %c1] : memref<1x3x422xf32, #tpu.memory_space<vmem>>, vector<1x3x384xf32>
    %4 = vector.shape_cast %3 : vector<1x3x384xf32> to vector<3x384xf32>
    %c3 = arith.constant 3 : index
    %c0_6 = arith.constant 0 : index
    %5 = vector.load %arg7[%c3, %c0_6] : memref<27x384xf32, #tpu.memory_space<vmem>>, vector<3x384xf32>
    tpu.vector_store %arg7[%c3, %c0_6], %4 {strides = array<i32>} : memref<27x384xf32, #tpu.memory_space<vmem>>, vector<3x384xf32>,
    %c0_7 = arith.constant 0 : index
    %c0_8 = arith.constant 0 : index
    %c2 = arith.constant 2 : index
    %6 = vector.load %arg1[%c0_7, %c0_8, %c2] : memref<1x3x422xf32, #tpu.memory_space<vmem>>, vector<1x3x384xf32>
    %7 = vector.shape_cast %6 : vector<1x3x384xf32> to vector<3x384xf32>
    %c6 = arith.constant 6 : index
    %c0_9 = arith.constant 0 : index
    %8 = vector.load %arg7[%c6, %c0_9] : memref<27x384xf32, #tpu.memory_space<vmem>>, vector<3x384xf32>
    tpu.vector_store %arg7[%c6, %c0_9], %7 {strides = array<i32>} : memref<27x384xf32, #tpu.memory_space<vmem>>, vector<3x384xf32>,
    %c0_10 = arith.constant 0 : index
    %c0_11 = arith.constant 0 : index
    %c18 = arith.constant 18 : index
    %9 = vector.load %arg1[%c0_10, %c0_11, %c18] : memref<1x3x422xf32, #tpu.memory_space<vmem>>, vector<1x3x384xf32>
    %10 = vector.shape_cast %9 : vector<1x3x384xf32> to vector<3x384xf32>
    %c9 = arith.constant 9 : index
    %c0_12 = arith.constant 0 : index
    %11 = vector.load %arg7[%c9, %c0_12] : memref<27x384xf32, #tpu.memory_space<vmem>>, vector<3x384xf32>
    tpu.vector_store %arg7[%c9, %c0_12], %10 {strides = array<i32>} : memref<27x384xf32, #tpu.memory_space<vmem>>, vector<3x384xf32>,
    %c0_13 = arith.constant 0 : index
    %c0_14 = arith.constant 0 : index
    %c19 = arith.constant 19 : index
    %12 = vector.load %arg1[%c0_13, %c0_14, %c19] : memref<1x3x422xf32, #tpu.memory_space<vmem>>, vector<1x3x384xf32>
    %13 = vector.shape_cast %12 : vector<1x3x384xf32> to vector<3x384xf32>
    %c12 = arith.constant 12 : index
    %c0_15 = arith.constant 0 : index
    %14 = vector.load %arg7[%c12, %c0_15] : memref<27x384xf32, #tpu.memory_space<vmem>>, vector<3x384xf32>
    tpu.vector_store %arg7[%c12, %c0_15], %13 {strides = array<i32>} : memref<27x384xf32, #tpu.memory_space<vmem>>, vector<3x384xf32>,
    %c0_16 = arith.constant 0 : index
    %c0_17 = arith.constant 0 : index
    %c20 = arith.constant 20 : index
    %15 = vector.load %arg1[%c0_16, %c0_17, %c20] : memref<1x3x422xf32, #tpu.memory_space<vmem>>, vector<1x3x384xf32>
    %16 = vector.shape_cast %15 : vector<1x3x384xf32> to vector<3x384xf32>
    %c15 = arith.constant 15 : index
    %c0_18 = arith.constant 0 : index
    %17 = vector.load %arg7[%c15, %c0_18] : memref<27x384xf32, #tpu.memory_space<vmem>>, vector<3x384xf32>
    tpu.vector_store %arg7[%c15, %c0_18], %16 {strides = array<i32>} : memref<27x384xf32, #tpu.memory_space<vmem>>, vector<3x384xf32>,
    %c0_19 = arith.constant 0 : index
    %c0_20 = arith.constant 0 : index
    %c36 = arith.constant 36 : index
    %18 = vector.load %arg1[%c0_19, %c0_20, %c36] : memref<1x3x422xf32, #tpu.memory_space<vmem>>, vector<1x3x384xf32>
    %19 = vector.shape_cast %18 : vector<1x3x384xf32> to vector<3x384xf32>
    %c18_21 = arith.constant 18 : index
    %c0_22 = arith.constant 0 : index
    %20 = vector.load %arg7[%c18_21, %c0_22] : memref<27x384xf32, #tpu.memory_space<vmem>>, vector<3x384xf32>
    tpu.vector_store %arg7[%c18_21, %c0_22], %19 {strides = array<i32>} : memref<27x384xf32, #tpu.memory_space<vmem>>, vector<3x384xf32>,
    %c0_23 = arith.constant 0 : index
    %c0_24 = arith.constant 0 : index
    %c37 = arith.constant 37 : index
    %21 = vector.load %arg1[%c0_23, %c0_24, %c37] : memref<1x3x422xf32, #tpu.memory_space<vmem>>, vector<1x3x384xf32>
    %22 = vector.shape_cast %21 : vector<1x3x384xf32> to vector<3x384xf32>
    %c21 = arith.constant 21 : index
    %c0_25 = arith.constant 0 : index
    %23 = vector.load %arg7[%c21, %c0_25] : memref<27x384xf32, #tpu.memory_space<vmem>>, vector<3x384xf32>
    tpu.vector_store %arg7[%c21, %c0_25], %22 {strides = array<i32>} : memref<27x384xf32, #tpu.memory_space<vmem>>, vector<3x384xf32>,
    %c0_26 = arith.constant 0 : index
    %c0_27 = arith.constant 0 : index
    %c38 = arith.constant 38 : index
    %24 = vector.load %arg1[%c0_26, %c0_27, %c38] : memref<1x3x422xf32, #tpu.memory_space<vmem>>, vector<1x3x384xf32>
    %25 = vector.shape_cast %24 : vector<1x3x384xf32> to vector<3x384xf32>
    %c24 = arith.constant 24 : index
    %c0_28 = arith.constant 0 : index
    %26 = vector.load %arg7[%c24, %c0_28] : memref<27x384xf32, #tpu.memory_space<vmem>>, vector<3x384xf32>
    tpu.vector_store %arg7[%c24, %c0_28], %25 {strides = array<i32>} : memref<27x384xf32, #tpu.memory_space<vmem>>, vector<3x384xf32>,
    %c0_29 = arith.constant 0 : index
    %c0_30 = arith.constant 0 : index
    %27 = vector.load %arg2[%c0_29, %c0_30] : memref<3x27xf32, #tpu.memory_space<vmem>>, vector<3x27xf32>
    %c0_31 = arith.constant 0 : index
    %c0_32 = arith.constant 0 : index
    %28 = vector.load %arg7[%c0_31, %c0_32] : memref<27x384xf32, #tpu.memory_space<vmem>>, vector<27x384xf32>
    %cst = arith.constant dense<0.000000e+00> : vector<3x384xf32>
    %29 = tpu.matmul %27, %28, %cst {dimension_numbers = #tpu.dot_dimension_numbers<[1], [0], [0], [1], [0, 0, 1, 1], [], []>} : vector<3x27xf32>, vector<27x384xf32>, vector<3x384xf32> -> vector<3x384xf32>
    %c0_33 = arith.constant 0 : index
    %c0_34 = arith.constant 0 : index
    %30 = vector.load %arg3[%c0_33, %c0_34] : memref<1x384xf32, #tpu.memory_space<vmem>>, vector<1x384xf32>
    %31 = vector.broadcast %30 : vector<1x384xf32> to vector<3x384xf32>
    %32 = arith.mulf %29, %31 : vector<3x384xf32>
    %cst_35 = arith.constant dense<0.000000e+00> : vector<3xf32>
    %33 = vector.multi_reduction <add>, %32, %cst_35 [1] : vector<3x384xf32> to vector<3xf32>
    %34 = vector.shape_cast %33 : vector<3xf32> to vector<3x1xf32>
    %c0_36 = arith.constant 0 : index
    %c0_37 = arith.constant 0 : index
    %c0_38 = arith.constant 0 : index
    %35 = vector.load %arg5[%c0_36, %c0_37, %c0_38] : memref<1x3x1xf32, #tpu.memory_space<vmem>>, vector<1x3x1xf32>
    %36 = vector.shape_cast %35 : vector<1x3x1xf32> to vector<3x1xf32>
    %37 = vector.shape_cast %34 : vector<3x1xf32> to vector<1x3x1xf32>
    tpu.vector_store %arg5[%c0_36, %c0_37, %c0_38], %37 {strides = array<i32>} : memref<1x3x1xf32, #tpu.memory_space<vmem>>, vector<1x3x1xf32>,
    %38 = arith.mulf %32, %32 : vector<3x384xf32>
    %cst_39 = arith.constant dense<0.000000e+00> : vector<3xf32>
    %39 = vector.multi_reduction <add>, %38, %cst_39 [1] : vector<3x384xf32> to vector<3xf32>
    %40 = vector.shape_cast %39 : vector<3xf32> to vector<3x1xf32>
    %c0_40 = arith.constant 0 : index
    %c0_41 = arith.constant 0 : index
    %c0_42 = arith.constant 0 : index
    %41 = vector.load %arg6[%c0_40, %c0_41, %c0_42] : memref<1x3x1xf32, #tpu.memory_space<vmem>>, vector<1x3x1xf32>
    %42 = vector.shape_cast %41 : vector<1x3x1xf32> to vector<3x1xf32>
    %43 = vector.shape_cast %40 : vector<3x1xf32> to vector<1x3x1xf32>
    tpu.vector_store %arg6[%c0_40, %c0_41, %c0_42], %43 {strides = array<i32>} : memref<1x3x1xf32, #tpu.memory_space<vmem>>, vector<1x3x1xf32>,
    %c0_43 = arith.constant 0 : index
    %c0_44 = arith.constant 0 : index
    %c0_45 = arith.constant 0 : index
    %44 = vector.load %arg4[%c0_43, %c0_44, %c0_45] : memref<1x3x384xf32, #tpu.memory_space<vmem>>, vector<1x3x384xf32>
    %45 = vector.shape_cast %44 : vector<1x3x384xf32> to vector<3x384xf32>
    %46 = vector.shape_cast %29 : vector<3x384xf32> to vector<1x3x384xf32>
    tpu.vector_store %arg4[%c0_43, %c0_44, %c0_45], %46 {strides = array<i32>} : memref<1x3x384xf32, #tpu.memory_space<vmem>>, vector<1x3x384xf32>,
    return
  }
  func.func @transform_0(%arg0: i32) -> (i32, i32, i32) {
    %c0_i32 = arith.constant 0 : i32
    %c0_i32_0 = arith.constant 0 : i32
    %c0_i32_1 = arith.constant 0 : i32
    return %arg0, %c0_i32, %c0_i32_0 : i32, i32, i32
  }
  func.func @transform_1(%arg0: i32) -> (i32, i32) {
    %c0_i32 = arith.constant 0 : i32
    %c0_i32_0 = arith.constant 0 : i32
    %c0_i32_1 = arith.constant 0 : i32
    return %c0_i32, %c0_i32_0 : i32, i32
  }
  func.func @transform_2(%arg0: i32) -> (i32, i32) {
    %c0_i32 = arith.constant 0 : i32
    %c0_i32_0 = arith.constant 0 : i32
    %c0_i32_1 = arith.constant 0 : i32
    return %c0_i32, %c0_i32_0 : i32, i32
  }
  func.func @transform_3(%arg0: i32) -> (i32, i32, i32) {
    %c0_i32 = arith.constant 0 : i32
    %c0_i32_0 = arith.constant 0 : i32
    %c0_i32_1 = arith.constant 0 : i32
    return %arg0, %c0_i32, %c0_i32_0 : i32, i32, i32
  }
  func.func @transform_4(%arg0: i32) -> (i32, i32, i32) {
    %c0_i32 = arith.constant 0 : i32
    %c0_i32_0 = arith.constant 0 : i32
    %c0_i32_1 = arith.constant 0 : i32
    return %arg0, %c0_i32, %c0_i32_0 : i32, i32, i32
  }
  func.func @transform_5(%arg0: i32) -> (i32, i32, i32) {
    %c0_i32 = arith.constant 0 : i32
    %c0_i32_0 = arith.constant 0 : i32
    %c0_i32_1 = arith.constant 0 : i32
    return %arg0, %c0_i32, %c0_i32_0 : i32, i32, i32
  }
}

module attributes {stable_mosaic.version = 11 : i64} {
  func.func @bn_relu_kernel(%arg0: i32, %arg1: memref<1x3x384xf32, #tpu.memory_space<vmem>>, %arg2: memref<1x3x1xf32, #tpu.memory_space<vmem>>, %arg3: memref<1x3x1xf32, #tpu.memory_space<vmem>>, %arg4: memref<1x3x384xf32, #tpu.memory_space<vmem>>) attributes {dimension_semantics = [#tpu.dimension_semantics<parallel>], iteration_bounds = array<i64: 2>, scalar_prefetch = 0 : i64, scratch_operands = 0 : i64, tpu.core_type = #tpu.core_type<tc>, window_params = [{transform_indices = @transform_0, window_bounds = array<i64: 1, 3, 384>}, {pipeline_mode = #tpu.pipeline_mode<synchronous>, transform_indices = @transform_1, window_bounds = array<i64: 1, 3, 1>}, {pipeline_mode = #tpu.pipeline_mode<synchronous>, transform_indices = @transform_2, window_bounds = array<i64: 1, 3, 1>}, {transform_indices = @transform_3, window_bounds = array<i64: 1, 3, 384>}]} {
    %c0 = arith.constant 0 : index
    %c0_0 = arith.constant 0 : index
    %c0_1 = arith.constant 0 : index
    %0 = vector.load %arg1[%c0, %c0_0, %c0_1] : memref<1x3x384xf32, #tpu.memory_space<vmem>>, vector<1x3x384xf32>
    %c0_2 = arith.constant 0 : index
    %c0_3 = arith.constant 0 : index
    %c0_4 = arith.constant 0 : index
    %1 = vector.load %arg2[%c0_2, %c0_3, %c0_4] : memref<1x3x1xf32, #tpu.memory_space<vmem>>, vector<1x3x1xf32>
    %2 = vector.broadcast %1 : vector<1x3x1xf32> to vector<1x3x384xf32>
    %3 = arith.mulf %0, %2 : vector<1x3x384xf32>
    %c0_5 = arith.constant 0 : index
    %c0_6 = arith.constant 0 : index
    %c0_7 = arith.constant 0 : index
    %4 = vector.load %arg3[%c0_5, %c0_6, %c0_7] : memref<1x3x1xf32, #tpu.memory_space<vmem>>, vector<1x3x1xf32>
    %5 = vector.broadcast %4 : vector<1x3x1xf32> to vector<1x3x384xf32>
    %6 = arith.addf %3, %5 : vector<1x3x384xf32>
    %cst = arith.constant 0.000000e+00 : f32
    %7 = vector.broadcast %cst : f32 to vector<1x3x384xf32>
    %8 = arith.maximumf %6, %7 : vector<1x3x384xf32>
    %c0_8 = arith.constant 0 : index
    %c0_9 = arith.constant 0 : index
    %c0_10 = arith.constant 0 : index
    %9 = vector.load %arg4[%c0_8, %c0_9, %c0_10] : memref<1x3x384xf32, #tpu.memory_space<vmem>>, vector<1x3x384xf32>
    tpu.vector_store %arg4[%c0_8, %c0_9, %c0_10], %8 {strides = array<i32>} : memref<1x3x384xf32, #tpu.memory_space<vmem>>, vector<1x3x384xf32>,
    return
  }
  func.func @transform_0(%arg0: i32) -> (i32, i32, i32) {
    %c0_i32 = arith.constant 0 : i32
    %c0_i32_0 = arith.constant 0 : i32
    %c0_i32_1 = arith.constant 0 : i32
    return %arg0, %c0_i32, %c0_i32_0 : i32, i32, i32
  }
  func.func @transform_1(%arg0: i32) -> (i32, i32, i32) {
    %c0_i32 = arith.constant 0 : i32
    %c0_i32_0 = arith.constant 0 : i32
    %c0_i32_1 = arith.constant 0 : i32
    %c0_i32_2 = arith.constant 0 : i32
    return %c0_i32, %c0_i32_0, %c0_i32_1 : i32, i32, i32
  }
  func.func @transform_2(%arg0: i32) -> (i32, i32, i32) {
    %c0_i32 = arith.constant 0 : i32
    %c0_i32_0 = arith.constant 0 : i32
    %c0_i32_1 = arith.constant 0 : i32
    %c0_i32_2 = arith.constant 0 : i32
    return %c0_i32, %c0_i32_0, %c0_i32_1 : i32, i32, i32
  }
  func.func @transform_3(%arg0: i32) -> (i32, i32, i32) {
    %c0_i32 = arith.constant 0 : i32
    %c0_i32_0 = arith.constant 0 : i32
    %c0_i32_1 = arith.constant 0 : i32
    return %arg0, %c0_i32, %c0_i32_0 : i32, i32, i32
  }
}

</mosaic_0001>

<bundles_post_ra>
// kernel: cbr_forward.3
= control target key start
LH: loop header
LB: loop body
LE: loop exit
PB: predicated region body
PF: predicated region fallthrough
CT: control target
= control target key end

     0   :  { %s313_s12 = smov 0   ;;  %s336_s0 = inlined_call_operand.vmem [shape: f32[2,3,384], index: 0, kind: input, shape index: {}, may-alias: {0,3}]   ;;  %s337_s1 = inlined_call_operand.vmem [shape: f32[1,3,1], index: 1, kind: input, shape index: {}]   ;;  %s338_s2 = inlined_call_operand.vmem [shape: f32[1,3,1], index: 2, kind: input, shape index: {}]   ;;  %s339_s3 = inlined_call_operand.vmem [shape: f32[2,3,384], index: 3, kind: output, shape index: {}, may-alias: {0,3}]  }
   0x1 LB: > { %s262_s13 = sadd.s32 4294967295, %s289_s12   ;;  %p266_p0 = scmp.ge.s32.totalorder %s289_s12, 1  ;;  %s289_s12 = sphi %s313_s12, %s13_s12  }
   0x2   : > { %p137_p1 = scmp.lt.s32.totalorder %s289_s12, 3 }
   0x4   : > { %p138_p2 = pnand %p266_p0, %p137_p1 }
   0x5   : > { %v173_v0 = vld [vmem:[%s337_s1] sm:$0x7] (!%p138_p2)  ;;  %v291_v1 = vmov (!%p138_p2), 0   ;;  %p161_p3 = scmp.lt.s32.totalorder (!%p138_p2), %s262_s13, 1  ;;  %v292_v3 = vmov (!%p138_p2), 839922192   ;;  %v181_v5 = vlaneseq (!%p138_p2) }
   0x6   : > { %141 = sbr.rel (%p138_p2) target bundleno = 146 (0x92), region = 32  ;;  %282 = vset.pattern.permute.xlu0 (!%p138_p2), %v291_v1  ;;  %v188_v2 = vld [vmem:[%s338_s2] sm:$0x7] (!%p138_p2)  ;;  %v179_v4 = vunpack.c.l.s4 (!%p138_p2), %v292_v3 }
   0x7   : > { %176 = vperm.xlu0 (!%p138_p2), %282, %v173_v0   ;;  %v182_v7 = vshrl.u32 (!%p138_p2), %v181_v5, 7 }
   0x8   : > { %v180_v6 = vunpack.c.0.s8 (!%p138_p2), %v179_v4 }
   0xa   : > { %v183_v8 = vsub.s32 (!%p138_p2), %v180_v6, %v182_v7 }
   0xb   : > { %191 = vperm.xlu0 (!%p138_p2), %282, %v188_v2  }
   0xd   : > { %s341_s13 = smov (!%p161_p3, %s262_s13), 1 }
   0xe   : > { %s271_s18 = smul.u32 12, %s341_s13 }
  0x10   : > { %s165_s21 = scalar_lea.vmem %s336_s0, %s271_s18  ;;  %s170_s24 = scalar_lea.vmem %s339_s3, %s271_s18 }
  0x11   : > { %v171_v11 = vld [vmem:[%s165_s21] sm:$0x77]  ;;  %v172_v12 = vld [vmem:[%s165_s21 + $0x8] sm:$0x7] }
  0x86   : > { %v177_v9 = vpop.permute.xlu0 %176 }
  0x87   : > { %v184_v10 = vrot.slane %v177_v9, %v183_v8 }
  0x89   : > { %v186_v14 = vmul.f32 %v184_v10, %v171_v11  ;;  %v187_v15 = vmul.f32 %v184_v10, %v172_v12 }
  0x8a   : > { %v192_v13 = vpop.permute.xlu0 %191 }
  0x8b   : > { %v199_v16 = vrot.slane %v192_v13, %v183_v8 }
  0x8d   : > { %v201_v17 = vadd.f32 %v199_v16, %v186_v14  ;;  %v202_v18 = vadd.f32 %v199_v16, %v187_v15 }
  0x8f   : > { %v203_v19 = vmax.f32 %v201_v17, 0.0  ;;  %v204_v20 = vmax.f32 %v202_v18, 0.0 }
  0x91   : > { %205 = vst [vmem:[%s170_s24] sm:$0x77] %v203_v19  ;;  %206 = vst [vmem:[%s170_s24 + $0x8] sm:$0x7] %v204_v20 }
  0x92 PF: > { %s13_s12 = sadd.s32 1, %s289_s12  }
  0x93   : > { %p10_p4 = scmp.ge.s32.totalorder %s13_s12, 4  }
  0x95   :  { %12 = sbr.rel (!%p10_p4) target bundleno = 1 (0x1), region = 62 }

// kernel: cbr_forward.2
= control target key start
LH: loop header
LB: loop body
LE: loop exit
PB: predicated region body
PF: predicated region fallthrough
CT: control target
= control target key end

     0   :  { %s946_s18 = smov 0   ;;  %s1063_s0 = inlined_call_operand.vmem [shape: f32[2,3,422], index: 0, kind: input, shape index: {}]   ;;  %s1064_s1 = inlined_call_operand.vmem [shape: f32[3,27], index: 1, kind: input, shape index: {}]   ;;  %s1065_s2 = inlined_call_operand.vmem [shape: f32[1,384], index: 2, kind: input, shape index: {}]   ;;  %s1066_s3 = inlined_call_operand.vmem [shape: f32[2,3,384], index: 3, kind: output, shape index: {0}]   ;;  %s1067_s4 = inlined_call_operand.vmem [shape: f32[2,3,1], index: 4, kind: output, shape index: {1}]   ;;  %s1068_s5 = inlined_call_operand.vmem [shape: f32[2,3,1], index: 5, kind: output, shape index: {2}]  }
   0x1 LB: > { %s807_s19 = sadd.s32 4294967295, %s902_s18   ;;  %p811_p0 = scmp.ge.s32.totalorder %s902_s18, 1  ;;  %s902_s18 = sphi %s946_s18, %s16_s18  }
   0x2   : > { %p192_p1 = scmp.lt.s32.totalorder %s902_s18, 3 }
   0x4   : > { %p193_p2 = pnand %p811_p0, %p192_p1 }
   0x5   : > { %p228_p3 = scmp.lt.s32.totalorder (!%p193_p2), %s807_s19, 1  ;;  %s904_s24 = smov (!%p193_p2), 126   ;;  %v909_v43 = vmov (!%p193_p2), 0.0|0.0   ;;  %v913_v58 = vmov (!%p193_p2), 0.0   ;;  %vm914_vm0 = vmmov (!%p193_p2), 0   ;;  %vm272_vm1 = vcmask (!%p193_p2), 1039360  }
   0x6   : > { %196 = sbr.rel (%p193_p2) target bundleno = 571 (0x23b), region = 32  ;;  %s905_s25 = smov (!%p193_p2), 127   ;;  %851 = vmatprep.subr.bf16.mxu1 (!%p193_p2), %v909_v43  ;;  %567 = vmatprep.mubr.f32.mxu0 (!%p193_p2), %v913_v58  ;;  %vm300_vm2 = vcmask (!%p193_p2), 1031168   ;;  %vm331_vm3 = vcmask (!%p193_p2), 900096   ;;  %vm355_vm4 = vcmask (!%p193_p2), 891904   ;;  %vm383_vm5 = vcmask (!%p193_p2), 883712  }
   0x7   : > { %s906_s26 = smov (!%p193_p2), 110   ;;  %s907_s27 = smov (!%p193_p2), 109   ;;  %838 = vmatprep.mubr.msk.f32.mxu1 (!%p193_p2), %vm914_vm0, %v913_v58  ;;  %vm414_vm6 = vcmask (!%p193_p2), 752640   ;;  %vm442_vm7 = vcmask (!%p193_p2), 744448   ;;  %vm466_vm8 = vcmask (!%p193_p2), 736256   ;;  %vm493_vm9 = vcmask (!%p193_p2), 1042432  }
   0x8   : > { %s908_s28 = smov (!%p193_p2), 108   ;;  %s910_s29 = smov (!%p193_p2), 92   ;;  %vm915_vm10 = vmmov (!%p193_p2), 1   ;;  %vm489_vm12 = vcmask (!%p193_p2), 220160   ;;  %vm671_vm13 = vcmask (!%p193_p2), 2048  }
   0x9   : > { %s911_s30 = smov (!%p193_p2), 91   ;;  %s912_s6 = smov (!%p193_p2), 90   ;;  %vm1025_vm11 = vmpackc.low (!%p193_p2), %vm493_vm9, %vm915_vm10 }
   0xd   : > { %s1072_s19 = smov (!%p228_p3, %s807_s19), 1 }
   0xe   : > { %s824_s20 = sshll.u32 %s1072_s19, 4  ;;  %s858_s11 = smul.u32 12, %s1072_s19 }
   0xf   : > { %s960_s23 = scalar_lea.vmem %s1063_s0, %s824_s20  ;;  %s815_s15 = sshll.u32 %s1072_s19, 2 }
  0x10   : > { %v283_v0 = vld [vmem:[%s960_s23 + $0x8] sm:$0x77]  ;;  %v254_v5 = vld [vmem:[%s960_s23] sm:$0x77]  ;;  %s237_s14 = scalar_lea.vmem %s1066_s3, %s858_s11  ;;  %s241_s20 = scalar_lea.vmem %s1067_s4, %s815_s15 }
  0x11   : > { %v255_v1 = vld [vmem:[%s960_s23 + $0x8] sm:$0x77]  ;;  %v290_v3 = vrot.slane %v283_v0, 2  ;;  %v282_v6 = vld [vmem:[%s960_s23] sm:$0x77]  ;;  %v258_v7 = vcombine.high %v254_v5, %v254_v5  ;;  %v260_v26 = vrot.slane %v254_v5, 5  ;;  %v287_v31 = vcombine.high %v283_v0, %v283_v0 }
  0x12   : > { %v314_v2 = vld [vmem:[%s960_s23 + $0x8] sm:$0x77]  ;;  %v262_v4 = vrot.slane %v255_v1, 5  ;;  %v313_v8 = vld [vmem:[%s960_s23] sm:$0x77]  ;;  %v286_v10 = vcombine.high %v282_v6, %v282_v6  ;;  %v288_v25 = vrot.slane %v282_v6, 2  ;;  %v259_v28 = vcombine.high %v255_v1, %v255_v1 }
  0x13   : > { %296 = vrot.lane.b32.xlu1 %v290_v3, %s904_s24  ;;  %v321_v9 = vrot.slane %v314_v2, 7  ;;  %v317_v11 = vcombine.high %v313_v8, %v313_v8  ;;  %v261_v12 = vrot.slane %v258_v7, 5  ;;  %v342_v15 = vld [vmem:[%s960_s23 + $0x8] sm:$0x77]  ;;  %v365_v16 = vld [vmem:[%s960_s23] sm:$0x77]  ;;  %v318_v34 = vcombine.high %v314_v2, %v314_v2 }
  0x14   : > { %268 = vrot.lane.b32.xlu0 %v262_v4, %s905_s25  ;;  %v289_v13 = vrot.slane %v286_v10, 2  ;;  %v246_v17 = vld [vmem:[%s960_s23] sm:$0x77]  ;;  %v346_v18 = vcombine.low %v342_v15, %v342_v15  ;;  %v369_v19 = vcombine.high %v365_v16, %v365_v16  ;;  %v366_v22 = vld [vmem:[%s960_s23 + $0x8] sm:$0x77]  ;;  %v319_v30 = vrot.slane %v313_v8, 7 }
  0x15   : > { %v320_v14 = vrot.slane %v317_v11, 7  ;;  %251 = vst [vmem:[#allocation2] sm:$0x7] %v246_v17  ;;  %v249_v20 = vcombine.high %v246_v17, %v246_v17  ;;  %v341_v21 = vld [vmem:[%s960_s23] sm:$0x77]  ;;  %v373_v23 = vrot.slane %v366_v22, 1  ;;  %v370_v37 = vcombine.high %v366_v22, %v366_v22 }
  0x16   : > { %v372_v24 = vrot.slane %v369_v19, 1  ;;  %v247_v27 = vld [vmem:[%s960_s23 + $0x8] sm:$0x7]  ;;  %v345_v29 = vcombine.low %v341_v21, %v341_v21  ;;  %v263_v32 = vrot.slane %v259_v28, 5  ;;  %v371_v33 = vrot.slane %v365_v16, 1 }
  0x17   : > { %327 = vrot.lane.b32.xlu1 %v321_v9, %s906_s26  ;;  %252 = vst [vmem:[#allocation2 + $0x8] sm:$0x7] %v249_v20  ;;  %253 = vst [vmem:[#allocation2 + $0x10] sm:$0x7] %v247_v27  ;;  %v322_v35 = vrot.slane %v318_v34, 7  ;;  %v291_v36 = vrot.slane %v287_v31, 2 }
  0x18   : > { %266 = vrot.lane.b32.xlu0 %v261_v12, %s905_s25  ;;  %v396_v38 = vld [vmem:[%s960_s23] sm:$0x77]  ;;  %v374_v39 = vrot.slane %v370_v37, 1  ;;  %v397_v41 = vld [vmem:[%s960_s23 + $0x8] sm:$0x77] }
  0x19   : > { %v400_v40 = vcombine.high %v396_v38, %v396_v38  ;;  %v424_v42 = vld [vmem:[%s960_s23] sm:$0x77]  ;;  %v404_v44 = vrot.slane %v397_v41, 6  ;;  %v425_v47 = vld [vmem:[%s960_s23 + $0x8] sm:$0x77]  ;;  %v402_v54 = vrot.slane %v396_v38, 6  ;;  %v401_v55 = vcombine.high %v397_v41, %v397_v41 }
  0x1a   : > { %v428_v46 = vcombine.high %v424_v42, %v424_v42  ;;  %v432_v48 = vrot.slane %v425_v47, 3  ;;  %v452_v50 = vld [vmem:[%s960_s23] sm:$0x77]  ;;  %v453_v52 = vld [vmem:[%s960_s23 + $0x8] sm:$0x77]  ;;  %v430_v53 = vrot.slane %v424_v42, 3  ;;  %v429_v57 = vcombine.high %v425_v47, %v425_v47  ;;  %s245_s23 = scalar_lea.vmem %s1068_s5, %s815_s15 }
  0x1b   : > { %294 = vrot.lane.b32.xlu1 %v289_v13, %s904_s24  ;;  %v403_v45 = vrot.slane %v400_v40, 6  ;;  %v456_v51 = vcombine.high %v452_v50, %v452_v50  ;;  %v405_v56 = vrot.slane %v401_v55, 6  ;;  %v457_v59 = vcombine.high %v453_v52, %v453_v52 }
  0x1c   : > { %325 = vrot.lane.b32.xlu0 %v320_v14, %s906_s26  ;;  %v431_v49 = vrot.slane %v428_v46, 3  ;;  %v433_v60 = vrot.slane %v429_v57, 3 }
  0x1f   : > { %351 = vrot.lane.b32.xlu1 %v346_v18, %s907_s27 }
  0x20   : > { %349 = vrot.lane.b32.xlu0 %v341_v21, %s907_s27 }
  0x23   : > { %379 = vrot.lane.b32.xlu1 %v373_v23, %s908_s28 }
  0x24   : > { %377 = vrot.lane.b32.xlu0 %v372_v24, %s908_s28 }
  0x27   : > { %292 = vrot.lane.b32.xlu1 %v288_v25, %s904_s24 }
  0x28   : > { %264 = vrot.lane.b32.xlu0 %v260_v26, %s905_s25 }
  0x2b   : > { %347 = vrot.lane.b32.xlu1 %v345_v29, %s907_s27 }
  0x2c   : > { %323 = vrot.lane.b32.xlu0 %v319_v30, %s906_s26 }
  0x2f   : > { %270 = vrot.lane.b32.xlu1 %v263_v32, %s905_s25 }
  0x30   : > { %375 = vrot.lane.b32.xlu0 %v371_v33, %s908_s28 }
  0x33   : > { %329 = vrot.lane.b32.xlu1 %v322_v35, %s906_s26 }
  0x34   : > { %298 = vrot.lane.b32.xlu0 %v291_v36, %s904_s24 }
  0x37   : > { %381 = vrot.lane.b32.xlu1 %v374_v39, %s908_s28 }
  0x38   : > { %353 = vrot.lane.b32.xlu0 %v342_v15, %s907_s27 }
  0x3b   : > { %410 = vrot.lane.b32.xlu1 %v404_v44, %s910_s29 }
  0x3c   : > { %408 = vrot.lane.b32.xlu0 %v403_v45, %s910_s29 }
  0x3f   : > { %438 = vrot.lane.b32.xlu1 %v432_v48, %s911_s30 }
  0x40   : > { %436 = vrot.lane.b32.xlu0 %v431_v49, %s911_s30 }
  0x43   : > { %462 = vrot.lane.b32.xlu1 %v453_v52, %s912_s6 }
  0x44   : > { %460 = vrot.lane.b32.xlu0 %v456_v51, %s912_s6 }
  0x47   : > { %434 = vrot.lane.b32.xlu1 %v430_v53, %s911_s30 }
  0x48   : > { %406 = vrot.lane.b32.xlu0 %v402_v54, %s910_s29 }
  0x4b   : > { %412 = vrot.lane.b32.xlu1 %v405_v56, %s910_s29 }
  0x4c   : > { %458 = vrot.lane.b32.xlu0 %v452_v50, %s912_s6 }
  0x4f   : > { %464 = vrot.lane.b32.xlu1 %v457_v59, %s912_s6 }
  0x50   : > { %440 = vrot.lane.b32.xlu0 %v433_v60, %s911_s30 }
  0x85   : > { %v297_v61 = vpop.permute.xlu1 %296 }
  0x86   : > { %v269_v62 = vpop.permute.xlu0 %268 }
  0x89   : > { %v328_v63 = vpop.permute.xlu1 %327 }
  0x8a   : > { %v267_v0 = vpop.permute.xlu0 %266 }
  0x8b   : > { %v274_v1 = vsel %vm272_vm1, %v267_v0, %v269_v62 }
  0x8c   : > { %280 = vst [vmem:[#allocation2 + $0x8] sm:$0x38] %v274_v1 }
  0x8d   : > { %v295_v2 = vpop.permute.xlu1 %294 }
  0x8e   : > { %v326_v3 = vpop.permute.xlu0 %325  ;;  %v302_v4 = vsel %vm300_vm2, %v295_v2, %v297_v61 }
  0x8f   : > { %v333_v5 = vsel %vm331_vm3, %v326_v3, %v328_v63  ;;  %308 = vst [vmem:[#allocation2 + $0x20] ss:$-20 sps:$4 sm:$0xc1] %v302_v4  }
  0x90   : > { %339 = vst [vmem:[#allocation2 + $0x20] sm:$0xe] %v333_v5  ;;  %v476_v5 = vld [vmem:[%s1064_s1] sm:$0x7] }
  0x91   : > { %v352_v6 = vpop.permute.xlu1 %351 }
  0x92   : > { %v350_v7 = vpop.permute.xlu0 %349 }
  0x93   : > { %v357_v8 = vsel %vm355_vm4, %v350_v7, %v352_v6 }
  0x94   : > { %363 = vst [vmem:[#allocation2 + $0x20] sm:$0x70] %v357_v8 }
  0x95   : > { %v380_v9 = vpop.permute.xlu1 %379 }
  0x96   : > { %v378_v10 = vpop.permute.xlu0 %377  ;;  %v478_v20 = vld [vmem:[#allocation2 + $0x8] sm:$0xff] }
  0x97   : > { %v385_v11 = vsel %vm383_vm5, %v378_v10, %v380_v9 }
  0x98   : > { %391 = vst [vmem:[#allocation2 + $0x38] ss:$-20 sps:$4 sm:$0x83] %v385_v11  }
  0x99   : > { %v293_v12 = vpop.permute.xlu1 %292 }
  0x9a   : > { %v265_v13 = vpop.permute.xlu0 %264  ;;  %v301_v14 = vsel %vm300_vm2, %v293_v12, %v295_v2  ;;  %v644_v12 = vld [vmem:[%s1065_s2] sm:$0x7] }
  0x9b   : > { %v273_v15 = vsel %vm272_vm1, %v265_v13, %v267_v0  ;;  %307 = vst [vmem:[#allocation2 + $0x18] ss:$-20 sps:$4 sm:$0xc1] %v301_v14  }
  0x9c   : > { %279 = vst [vmem:[#allocation2] sm:$0x38] %v273_v15 }
  0x9d   : > { %v348_v16 = vpop.permute.xlu1 %347 }
  0x9e   : > { %v324_v17 = vpop.permute.xlu0 %323  ;;  %v356_v18 = vsel %vm355_vm4, %v348_v16, %v350_v7 }
  0x9f   : > { %v332_v19 = vsel %vm331_vm3, %v324_v17, %v326_v3  ;;  %v481_v21 = vld [vmem:[#allocation2 + $0x20] sm:$0xff]  ;;  %362 = vst [vmem:[#allocation2 + $0x18] sm:$0x70] %v356_v18 }
  0xa0   : > { %338 = vst [vmem:[#allocation2 + $0x18] sm:$0xe] %v332_v19  ;;  %v841_v22 = vpack.c.bf16 %v481_v21, %v478_v20 }
  0xa1   : > { %v271_v23 = vpop.permute.xlu1 %270 }
  0xa2   : > { %v376_v24 = vpop.permute.xlu0 %375  ;;  %842 = vmatprep.subr.bf16.mxu0 %v841_v22  ;;  %v275_v25 = vsel %vm272_vm1, %v269_v62, %v271_v23 }
  0xa3   : > { %v384_v26 = vsel %vm383_vm5, %v376_v24, %v378_v10  ;;  %281 = vst [vmem:[#allocation2 + $0x10] sm:$0x38] %v275_v25  ;;  %v477_v35 = vld [vmem:[#allocation2] sm:$0xff] }
  0xa4   : > { %390 = vst [vmem:[#allocation2 + $0x30] ss:$-20 sps:$4 sm:$0x83] %v384_v26  }
  0xa5   : > { %v330_v27 = vpop.permute.xlu1 %329 }
  0xa6   : > { %v299_v28 = vpop.permute.xlu0 %298  ;;  %v334_v29 = vsel %vm331_vm3, %v328_v63, %v330_v27 }
  0xa7   : > { %v303_v30 = vsel %vm300_vm2, %v297_v61, %v299_v28  ;;  %340 = vst [vmem:[#allocation2 + $0x28] sm:$0xe] %v334_v29 }
  0xa8   : > { %309 = vst [vmem:[#allocation2 + $0x28] ss:$-20 sps:$4 sm:$0xc1] %v303_v30  }
  0xa9   : > { %v382_v31 = vpop.permute.xlu1 %381 }
  0xaa   : > { %v354_v32 = vpop.permute.xlu0 %353  ;;  %v386_v33 = vsel %vm383_vm5, %v380_v9, %v382_v31  ;;  %v646_v9 = vlaneseq }
  0xab   : > { %v358_v34 = vsel %vm355_vm4, %v352_v6, %v354_v32  ;;  %v480_v36 = vld [vmem:[#allocation2 + $0x18] sm:$0xff]  ;;  %392 = vst [vmem:[#allocation2 + $0x40] ss:$-20 sps:$4 sm:$0x83] %v386_v33  }
  0xac   : > { %364 = vst [vmem:[#allocation2 + $0x28] sm:$0x70] %v358_v34  ;;  %v843_v37 = vpack.c.bf16 %v480_v36, %v477_v35  ;;  %v647_v10 = vshrl.u32 %v646_v9, 7 }
  0xad   : > { %v411_v38 = vpop.permute.xlu1 %410 }
  0xae   : > { %v409_v39 = vpop.permute.xlu0 %408  ;;  %844 = vmatpush1.bf16.msra.mxu0 %v843_v37  ;;  %v648_v11 = vsub.s32 0, %v647_v10  ;;  %v652_v13 = vsub.s32 1, %v647_v10  ;;  %v656_v15 = vsub.s32 2, %v647_v10 }
  0xaf   : > { %v416_v40 = vsel %vm414_vm6, %v409_v39, %v411_v38  ;;  %v479_v45 = vld [vmem:[#allocation2 + $0x10] sm:$0xff] }
  0xb0   : > { %422 = vst [vmem:[#allocation2 + $0x38] sm:$0x1c] %v416_v40  ;;  %v649_v14 = vrot.slane %v644_v12, %v648_v11  ;;  %v653_v16 = vrot.slane %v644_v12, %v652_v13  ;;  %v657_v20 = vrot.slane %v644_v12, %v656_v15 }
  0xb1   : > { %v439_v41 = vpop.permute.xlu1 %438 }
  0xb2   : > { %v437_v42 = vpop.permute.xlu0 %436 }
  0xb3   : > { %v444_v44 = vsel %vm442_vm7, %v437_v42, %v439_v41  ;;  %v482_v46 = vld [vmem:[#allocation2 + $0x28] sm:$0xff] }
  0xb4   : > { %450 = vst [vmem:[#allocation2 + $0x38] sm:$0xe0] %v444_v44  ;;  %v852_v47 = vpack.c.bf16 %v482_v46, %v479_v45 }
  0xb5   : > { %v463_v48 = vpop.permute.xlu1 %462 }
  0xb6   : > { %v461_v49 = vpop.permute.xlu0 %460  ;;  %853 = vmatpush3.bf16.msra.mxu1 %v852_v47 }
  0xb7   : > { %v468_v50 = vsel %vm466_vm8, %v461_v49, %v463_v48  ;;  %854 = vmatprep.subr.bf16.mxu1 %v909_v43 }
  0xb8   : > { %474 = vst [vmem:[#allocation2 + $0x50] sm:$0x7] %v468_v50 }
  0xb9   : > { %v435_v51 = vpop.permute.xlu1 %434 }
  0xba   : > { %v407_v52 = vpop.permute.xlu0 %406  ;;  %v443_v53 = vsel %vm442_vm7, %v435_v51, %v437_v42 }
  0xbb   : > { %v415_v54 = vsel %vm414_vm6, %v407_v52, %v409_v39  ;;  %449 = vst [vmem:[#allocation2 + $0x30] sm:$0xe0] %v443_v53  ;;  %v484_v59 = vld [vmem:[#allocation2 + $0x38] sm:$0xff] }
  0xbc   : > { %421 = vst [vmem:[#allocation2 + $0x30] sm:$0x1c] %v415_v54 }
  0xbd   : > { %v413_v55 = vpop.permute.xlu1 %412 }
  0xbe   : > { %v459_v56 = vpop.permute.xlu0 %458  ;;  %v417_v57 = vsel %vm414_vm6, %v411_v38, %v413_v55 }
  0xbf   : > { %v467_v58 = vsel %vm466_vm8, %v459_v56, %v461_v49  ;;  %v487_v60 = vld [vmem:[#allocation2 + $0x50] sm:$0x7]  ;;  %423 = vst [vmem:[#allocation2 + $0x40] sm:$0x1c] %v417_v57 }
  0xc0   : > { %473 = vst [vmem:[#allocation2 + $0x48] sm:$0x7] %v467_v58  ;;  %v845_v61 = vpack.c.bf16 %v487_v60, %v484_v59 }
  0xc1   : > { %v465_v62 = vpop.permute.xlu1 %464 }
  0xc2   : > { %v441_v63 = vpop.permute.xlu0 %440  ;;  %847 = vmatprep.subr.msk.bf16.mxu0 %vm1025_vm11, %v845_v61  ;;  %v469_v0 = vsel %vm466_vm8, %v463_v48, %v465_v62 }
  0xc3   : > { %v445_v1 = vsel %vm442_vm7, %v439_v41, %v441_v63  ;;  %475 = vst [vmem:[#allocation2 + $0x58] sm:$0x7] %v469_v0  ;;  %v483_v2 = vld [vmem:[#allocation2 + $0x30] sm:$0xff] }
  0xc4   : > { %451 = vst [vmem:[#allocation2 + $0x40] sm:$0xe0] %v445_v1 }
  0xc7   : > { %v486_v3 = vld [vmem:[#allocation2 + $0x48] sm:$0x7] }
  0xc8   : > { %v848_v4 = vpack.c.bf16 %v486_v3, %v483_v2 }
  0xca   : > { %850 = vmatpush1.bf16.msk.msra.mxu0 %vm1025_vm11, %v848_v4  ;;  %v488_v7 = vld [vmem:[#allocation2 + $0x58] sm:$0x7] }
  0xcb   : > { %v485_v6 = vld [vmem:[#allocation2 + $0x40] sm:$0xff] }
  0xcc   : > { %v855_v8 = vpack.c.bf16 %v488_v7, %v485_v6 }
  0xcd   : > { %819 = vmatmul.mubr.msk.f32.vlgmr.msra.gmra.mrb[0].mxu0 %vm489_vm12, %v476_v5 }
  0xce   : > { %857 = vmatpush3.bf16.msk.msra.mxu1 %vm1025_vm11, %v855_v8 }
  0xd1   : > { %839 = vmatmul.mubr.msk.f32.vlgmr.msra.gmra.mrb[0].mxu1 %vm489_vm12, %v476_v5 }
 0x1a0   : > { %v569_v17 = vpop.f32.mrb[0].mxu0 }
 0x1a1   : > { %v661_v18 = vmul.f32 %v649_v14, %v569_v17  ;;  %v571_v19 = vpop.f32.mrb[1].mxu0 }
 0x1a2   : > { %v662_v21 = vmul.f32 %v653_v16, %v571_v19  ;;  %v686_v22 = vcombine.low %v569_v17, %v571_v19 }
 0x1a3   : > { %v664_v23 = vsel %vm493_vm9, %v661_v18, 0.0  ;;  %v673_v24 = vmul.f32 %v661_v18, %v661_v18 }
 0x1a4   : > { %v665_v25 = vsel %vm493_vm9, %v662_v21, 0.0  ;;  %v674_v26 = vmul.f32 %v662_v21, %v662_v21  ;;  %688 = vst [vmem:[%s237_s14] sm:$0x77] %v686_v22  ;;  %v640_v27 = vpop.f32.mrb[0].mxu1 }
 0x1a5   : > { %v663_v28 = vmul.f32 %v657_v20, %v640_v27  ;;  %689 = vst [vmem:[%s237_s14 + $0x8] sm:$0x7] %v640_v27  ;;  %v840_v29 = vpop.f32.mrb[1].mxu1  ;;  %v666_v30 = vadd.f32 %v665_v25, %v664_v23  ;;  %v676_v31 = vsel %vm493_vm9, %v673_v24, 0.0 }
 0x1a6   : > { %v677_v32 = vsel %vm493_vm9, %v674_v26, 0.0 }
 0x1a7   : > { %v675_v33 = vmul.f32 %v663_v28, %v663_v28  ;;  %v667_v34 = vsel %vm493_vm9, %v663_v28, 0.0  ;;  %v678_v35 = vadd.f32 %v677_v32, %v676_v31 }
 0x1a8   : > { %v668_v36 = vadd.f32 %v667_v34, %v666_v30 }
 0x1a9   : > { %v679_v37 = vsel %vm493_vm9, %v675_v33, 0.0 }
 0x1aa   : > { %669 = vadd.xlane.f32.xlu0 %v668_v36  ;;  %v680_v38 = vadd.f32 %v679_v37, %v678_v35 }
 0x1ac   : > { %681 = vadd.xlane.f32.xlu1 %v680_v38 }
 0x237   : > { %v670_v39 = vpop.xlane.xlu0 %669 }
 0x238   : > { %672 = vst.msk [vmem:[%s241_s20] sm:$0x7] %vm671_vm13, %v670_v39 }
 0x239   : > { %v682_v40 = vpop.xlane.xlu1 %681 }
 0x23a   : > { %683 = vst.msk [vmem:[%s245_s23] sm:$0x7] %vm671_vm13, %v682_v40 }
 0x23b PF: > { %s16_s18 = sadd.s32 1, %s902_s18  }
 0x23c   : > { %p13_p4 = scmp.ge.s32.totalorder %s16_s18, 4  }
 0x23e   :  { %15 = sbr.rel (!%p13_p4) target bundleno = 1 (0x1), region = 86 }

</bundles_post_ra>
